<compile_context>
chip_gen: v5e
topology: v5e:2x2
jax: 0.10.0
libtpu: 0.0.40
codegen_flags: <defaults>
</compile_context>

<pallas_src>
import functools

import jax
import jax.numpy as jnp
from jax.experimental import pallas as pl
from jax.experimental.pallas import tpu as pltpu

N_EMBD = 128
HIDDEN = 4 * N_EMBD            # 512
DROPOUT = 0.2                  # eval-mode => identity


def _round_up(x, m):
    return ((x + m - 1) // m) * m


# ---- fused FFN kernel --------------------------------------------------------
def ffn_kernel(x_ref, w1_ref, b1_ref, w2_ref, b2_ref, o_ref, *, compute_dtype):
    # x_ref: (tile_m, D) f32 rows; w1/w2 are resident bf16; b1/b2 resident f32.
    x = x_ref[...].astype(compute_dtype)

    # Linear 1 (D -> 4D): bf16 operands, f32 accumulation on the MXU.
    h = jnp.dot(x, w1_ref[...], preferred_element_type=jnp.float32)
    # Bias + ReLU in f32, then immediately drop the large (tm, 4D) hidden to
    # bf16 so the value live between the two matmuls is half-width.
    h = jnp.maximum(h + b1_ref[...], 0.0).astype(compute_dtype)

    # Linear 2 (4D -> D): bf16 operands, f32 accumulation.
    y = jnp.dot(h, w2_ref[...], preferred_element_type=jnp.float32)
    y = y + b2_ref[...]

    # TODO(synk): nn.Dropout(0.2) is identity here (eval semantics); a
    # training-mode variant would use pltpu.prng_seed / stateful_bernoulli.
    o_ref[...] = y.astype(o_ref.dtype)


# ---- wrapper -----------------------------------------------------------------
def feed_forward(x, w1, b1, w2, b2, *, tile_m=1024,
                 compute_dtype=jnp.bfloat16):
    """y = relu(x @ w1 + b1) @ w2 + b2 over the last dim of x.

    x: (..., D) float32.  w1: (D, 4D), b1: (1, 4D), w2: (4D, D), b2: (1, D).
    (Weights are stored as the transpose of torch.nn.Linear.weight.)
    Dropout is treated as identity (eval semantics).
    """
    orig_shape = x.shape
    D = orig_shape[-1]
    H = w1.shape[1]

    # Cast weights to the matmul dtype ONCE, outside the kernel (no per-tile
    # VPU casts inside the grid loop).  Biases stay f32 for the f32 adds.
    w1c = w1.astype(compute_dtype)
    w2c = w2.astype(compute_dtype)

    # Fold all leading dims into the row (sublane) axis.
    x2 = x.reshape(-1, D)
    M = x2.shape[0]

    # Row tile: multiple of 8 (f32 sublane), capped at tile_m, and chosen so
    # that there are at least 2 row tiles whenever M allows it (lets v7x
    # shard the "parallel" axis across both TensorCores).
    m_rows = _round_up(M, 8)
    tm = min(tile_m, m_rows)
    if m_rows > 8:
        tm = min(tm, _round_up((m_rows + 1) // 2, 8))
    tm = max(tm, 8)

    m_pad = _round_up(M, tm)
    if m_pad != M:
        # NOTE: padded rows compute relu(b1)@w2+b2 (garbage) and are sliced
        # off below; they must never be reduced/accumulated before slicing.
        x2 = jnp.pad(x2, ((0, m_pad - M), (0, 0)))

    grid = (m_pad // tm,)
    kernel = functools.partial(ffn_kernel, compute_dtype=compute_dtype)

    out = pl.pallas_call(
        kernel,
        out_shape=jax.ShapeDtypeStruct((m_pad, D), x.dtype),
        grid=grid,
        in_specs=[
            pl.BlockSpec((tm, D), lambda i: (i, 0)),   # activations, tiled rows
            pl.BlockSpec((D, H), lambda i: (0, 0)),    # W1 resident (bf16)
            pl.BlockSpec((1, H), lambda i: (0, 0)),    # b1 resident (f32)
            pl.BlockSpec((H, D), lambda i: (0, 0)),    # W2 resident (bf16)
            pl.BlockSpec((1, D), lambda i: (0, 0)),    # b2 resident (f32)
        ],
        out_specs=pl.BlockSpec((tm, D), lambda i: (i, 0)),
        compiler_params=pltpu.CompilerParams(
            dimension_semantics=("parallel",)),        # independent row tiles
    )(x2, w1c, b1, w2c, b2)

    if m_pad != M:
        out = out[:M]
    return out.reshape(orig_shape)


# ---- pure-JAX reference (f32) ------------------------------------------------
def feed_forward_ref(x, w1, b1, w2, b2):
    h = jnp.maximum(x @ w1 + b1, 0.0)
    return h @ w2 + b2


# ---- deterministic init ------------------------------------------------------
def init_params(key):
    k1, k2 = jax.random.split(key)
    w1 = jax.random.normal(k1, (N_EMBD, HIDDEN), dtype=jnp.float32) * 0.02
    b1 = jnp.zeros((1, HIDDEN), jnp.float32)
    w2 = jax.random.normal(k2, (HIDDEN, N_EMBD), dtype=jnp.float32) * 0.02
    b2 = jnp.zeros((1, N_EMBD), jnp.float32)
    return w1, b1, w2, b2


if __name__ == "__main__":
    key = jax.random.PRNGKey(0)
    k_params, k_x = jax.random.split(key)

    w1, b1, w2, b2 = init_params(k_params)

    B, T = 2, 8                                       # small shapes, D = n_embd = 128
    x = jax.random.normal(k_x, (B, T, N_EMBD), dtype=jnp.float32)

    fwd = jax.jit(feed_forward)
    out = jax.block_until_ready(fwd(x, w1, b1, w2, b2))

    assert out.shape == (B, T, N_EMBD), out.shape
    assert bool(jnp.all(jnp.isfinite(out)))

    # bf16-matmul / f32-accumulate vs f32 reference: loose tolerance.
    ref = feed_forward_ref(x, w1, b1, w2, b2)
    max_err = float(jnp.max(jnp.abs(out - ref)))
    assert max_err < 5e-2, f"max abs err {max_err}"

    print("KERNEL_OK")
</pallas_src>

<mosaic_0001>
module attributes {stable_mosaic.version = 11 : i64} {
  func.func @ffn_kernel(%arg0: i32, %arg1: memref<8x128xf32, #tpu.memory_space<vmem>>, %arg2: memref<128x512xbf16, #tpu.memory_space<vmem>>, %arg3: memref<1x512xf32, #tpu.memory_space<vmem>>, %arg4: memref<512x128xbf16, #tpu.memory_space<vmem>>, %arg5: memref<1x128xf32, #tpu.memory_space<vmem>>, %arg6: memref<8x128xf32, #tpu.memory_space<vmem>>) attributes {dimension_semantics = [#tpu.dimension_semantics<parallel>], iteration_bounds = array<i64: 2>, scalar_prefetch = 0 : i64, scratch_operands = 0 : i64, tpu.core_type = #tpu.core_type<tc>, window_params = [{transform_indices = @transform_0, window_bounds = array<i64: 8, 128>}, {pipeline_mode = #tpu.pipeline_mode<synchronous>, transform_indices = @transform_1, window_bounds = array<i64: 128, 512>}, {pipeline_mode = #tpu.pipeline_mode<synchronous>, transform_indices = @transform_2, window_bounds = array<i64: 1, 512>}, {pipeline_mode = #tpu.pipeline_mode<synchronous>, transform_indices = @transform_3, window_bounds = array<i64: 512, 128>}, {pipeline_mode = #tpu.pipeline_mode<synchronous>, transform_indices = @transform_4, window_bounds = array<i64: 1, 128>}, {transform_indices = @transform_5, window_bounds = array<i64: 8, 128>}]} {
    %c0 = arith.constant 0 : index
    %c0_0 = arith.constant 0 : index
    %0 = vector.load %arg1[%c0, %c0_0] : memref<8x128xf32, #tpu.memory_space<vmem>>, vector<8x128xf32>
    %1 = arith.truncf %0 : vector<8x128xf32> to vector<8x128xbf16>
    %c0_1 = arith.constant 0 : index
    %c0_2 = arith.constant 0 : index
    %2 = vector.load %arg2[%c0_1, %c0_2] : memref<128x512xbf16, #tpu.memory_space<vmem>>, vector<128x512xbf16>
    %cst = arith.constant dense<0.000000e+00> : vector<8x512xf32>
    %3 = tpu.matmul %1, %2, %cst {dimension_numbers = #tpu.dot_dimension_numbers<[1], [0], [0], [1], [0, 0, 1, 1], [], []>} : vector<8x128xbf16>, vector<128x512xbf16>, vector<8x512xf32> -> vector<8x512xf32>
    %c0_3 = arith.constant 0 : index
    %c0_4 = arith.constant 0 : index
    %4 = vector.load %arg3[%c0_3, %c0_4] : memref<1x512xf32, #tpu.memory_space<vmem>>, vector<1x512xf32>
    %5 = vector.broadcast %4 : vector<1x512xf32> to vector<8x512xf32>
    %6 = arith.addf %3, %5 : vector<8x512xf32>
    %cst_5 = arith.constant 0.000000e+00 : f32
    %7 = vector.broadcast %cst_5 : f32 to vector<8x512xf32>
    %8 = arith.maximumf %6, %7 : vector<8x512xf32>
    %9 = arith.truncf %8 : vector<8x512xf32> to vector<8x512xbf16>
    %c0_6 = arith.constant 0 : index
    %c0_7 = arith.constant 0 : index
    %10 = vector.load %arg4[%c0_6, %c0_7] : memref<512x128xbf16, #tpu.memory_space<vmem>>, vector<512x128xbf16>
    %cst_8 = arith.constant dense<0.000000e+00> : vector<8x128xf32>
    %11 = tpu.matmul %9, %10, %cst_8 {dimension_numbers = #tpu.dot_dimension_numbers<[1], [0], [0], [1], [0, 0, 1, 1], [], []>} : vector<8x512xbf16>, vector<512x128xbf16>, vector<8x128xf32> -> vector<8x128xf32>
    %c0_9 = arith.constant 0 : index
    %c0_10 = arith.constant 0 : index
    %12 = vector.load %arg5[%c0_9, %c0_10] : memref<1x128xf32, #tpu.memory_space<vmem>>, vector<1x128xf32>
    %13 = vector.broadcast %12 : vector<1x128xf32> to vector<8x128xf32>
    %14 = arith.addf %11, %13 : vector<8x128xf32>
    %c0_11 = arith.constant 0 : index
    %c0_12 = arith.constant 0 : index
    %15 = vector.load %arg6[%c0_11, %c0_12] : memref<8x128xf32, #tpu.memory_space<vmem>>, vector<8x128xf32>
    tpu.vector_store %arg6[%c0_11, %c0_12], %14 {strides = array<i32>} : memref<8x128xf32, #tpu.memory_space<vmem>>, vector<8x128xf32>,
    return
  }
  func.func @transform_0(%arg0: i32) -> (i32, i32) {
    %c0_i32 = arith.constant 0 : i32
    %c0_i32_0 = arith.constant 0 : i32
    return %arg0, %c0_i32 : i32, i32
  }
  func.func @transform_1(%arg0: i32) -> (i32, i32) {
    %c0_i32 = arith.constant 0 : i32
    %c0_i32_0 = arith.constant 0 : i32
    %c0_i32_1 = arith.constant 0 : i32
    return %c0_i32, %c0_i32_0 : i32, i32
  }
  func.func @transform_2(%arg0: i32) -> (i32, i32) {
    %c0_i32 = arith.constant 0 : i32
    %c0_i32_0 = arith.constant 0 : i32
    %c0_i32_1 = arith.constant 0 : i32
    return %c0_i32, %c0_i32_0 : i32, i32
  }
  func.func @transform_3(%arg0: i32) -> (i32, i32) {
    %c0_i32 = arith.constant 0 : i32
    %c0_i32_0 = arith.constant 0 : i32
    %c0_i32_1 = arith.constant 0 : i32
    return %c0_i32, %c0_i32_0 : i32, i32
  }
  func.func @transform_4(%arg0: i32) -> (i32, i32) {
    %c0_i32 = arith.constant 0 : i32
    %c0_i32_0 = arith.constant 0 : i32
    %c0_i32_1 = arith.constant 0 : i32
    return %c0_i32, %c0_i32_0 : i32, i32
  }
  func.func @transform_5(%arg0: i32) -> (i32, i32) {
    %c0_i32 = arith.constant 0 : i32
    %c0_i32_0 = arith.constant 0 : i32
    return %arg0, %c0_i32 : i32, i32
  }
}

</mosaic_0001>

<bundles_post_ra>
// kernel: feed_forward.1
= control target key start
LH: loop header
LB: loop body
LE: loop exit
PB: predicated region body
PF: predicated region fallthrough
CT: control target
= control target key end

     0   :  { %10 = vsyncpa [#allocation3], 0  ;;  %s1715_s0 = inlined_call_operand.vmem [shape: f32[16,128], index: 0, kind: input, shape index: {}]   ;;  %s1716_s1 = inlined_call_operand.vmem [shape: bf16[128,512], index: 1, kind: input, shape index: {}]   ;;  %s1717_s2 = inlined_call_operand.vmem [shape: f32[1,512], index: 2, kind: input, shape index: {}]   ;;  %s1718_s3 = inlined_call_operand.vmem [shape: bf16[512,128], index: 3, kind: input, shape index: {}]   ;;  %s1719_s4 = inlined_call_operand.vmem [shape: f32[1,128], index: 4, kind: input, shape index: {}]   ;;  %s1720_s5 = inlined_call_operand.hbm [shape: f32[16,128], index: 5, kind: output, shape index: {}]  }
   0x1   :  { %12 = vsyncpa [#allocation3 + $0x1], 0  ;;  %s1336_s18 = smov 0   ;;  %s1338_s19 = smov 0  }
   0x2   :  { %s1340_s20 = smov 0   ;;  %s1342_s21 = smov 0  }
   0x3 LB: > { %s1357_s22 = sadd.s32 4294967295, %s1304_s21   ;;  %s872_s23 = sadd.s32 4294967294, %s1304_s21   ;;  %s1304_s21 = sphi %s1342_s21, %s1726_s21   ;;  %s1300_s20 = sphi %s1340_s20, %s1725_s20   ;;  %s1296_s19 = sphi %s1338_s19, %s1724_s19   ;;  %s1292_s18 = sphi %s1336_s18, %s1723_s18  }
   0x4   : > { %s1361_s24 = sadd.s32 1, %s1304_s21   ;;  %s135_s25 = sadd.s32 1, %s1300_s20 }
   0x5   : > { %s132_s26 = ssub.s32 %s1304_s21, %s1361_s24  ;;  %p145_p0 = scmp.ne.s32.totalorder %s1300_s20, %s1296_s19 }
   0x6   : > { %p133_p1 = scmp.eq.s32.totalorder %s132_s26, 0  ;;  %p146_p2 = scmp.eq.s32.totalorder %s1357_s22, 1 }
   0x7   : > { %p151_p3 = scmp.ne.s32.totalorder %s1296_s19, %s1292_s18  ;;  %p152_p4 = scmp.eq.s32.totalorder %s872_s23, 1 }
   0x8   : > { %s1372_s27 = scalar_select %p133_p1, %s1300_s20, %s135_s25  }
   0x9   : > { %p1374_p5 = por %p146_p2, %p145_p0  ;;  %p1378_p6 = por %p152_p4, %p151_p3 }
   0xa   : > { %p875_p7 = scmp.ge.s32.totalorder %s1304_s21, 1  ;;  %p189_p8 = scmp.lt.s32.totalorder %s1304_s21, 3 }
   0xc   : > { %p190_p9 = pnand %p875_p7, %p189_p8 }
   0xd   : > { %p216_p10 = scmp.lt.s32.totalorder (!%p190_p9), %s1357_s22, 1  ;;  %s213_s14 = sand.u32 (!%p190_p9), 1, %s1296_s19  }
   0xe   : > { %193 = sbr.rel (%p190_p9) target bundleno = 332 (0x14c), region = 40  ;;  %s876_s15 = sshll.u32 (!%p190_p9), %s213_s14, 3 }
   0xf   : > { %s1135_s16 = sshll.u32 (!%p190_p9), %s1357_s22, 3  ;;  %s215_s26 = scalar_lea.vmem (!%p190_p9), [#allocation2], %s876_s15 }
  0x10   : > { %s808_s25 = scalar_lea.hbm (!%p190_p9), %s1720_s5, %s1135_s16  ;;  %s1262_s11 = scalar_lea.hbm (!%p190_p9), %s1720_s5, 16 }
  0x11   : > { %s812_s7 = sshll.u32 (!%p190_p9), %s808_s25, 4  ;;  %s813_s7 = int_to_ptr.hbm [resolvable:$true] %s812_s7 }
  0x13   : > { %v1000_v0 = vld [vmem:[%s1716_s1 + $0xe8] sm:$0xf]  ;;  %v1169_v1 = vld [vmem:[%s1716_s1 + $0xf4] sm:$0xf0]  ;;  %v1167_v2 = vld [vmem:[%s1716_s1 + $0xec] sm:$0xf] }
  0x14   : > { %v1001_v3 = vor.u32 %v1169_v1, %v1000_v0  ;;  %v1002_v4 = vld [vmem:[%s1716_s1 + $0xf8] sm:$0xf0]  ;;  %v992_v5 = vld [vmem:[%s1716_s1 + $0xe0] sm:$0xf]  ;;  %v1168_v6 = vld [vmem:[%s1716_s1 + $0xec] sm:$0xf0] }
  0x15   : > { %v1005_v7 = vor.u32 %v1167_v2, %v1002_v4  ;;  %v993_v8 = vor.u32 %v1168_v6, %v992_v5  ;;  %v1166_v9 = vld [vmem:[%s1716_s1 + $0xe4] sm:$0xf]  ;;  %v994_v10 = vld [vmem:[%s1716_s1 + $0xf0] sm:$0xf0]  ;;  %v984_v11 = vld [vmem:[%s1716_s1 + $0xc8] sm:$0xf] }
  0x16   : > { %450 = vmatpush.bf16.msra.mxu2 %v1001_v3  ;;  %v997_v12 = vor.u32 %v1166_v9, %v994_v10  ;;  %v1165_v13 = vld [vmem:[%s1716_s1 + $0xd4] sm:$0xf0]  ;;  %v1163_v14 = vld [vmem:[%s1716_s1 + $0xcc] sm:$0xf]  ;;  %v986_v15 = vld [vmem:[%s1716_s1 + $0xd8] sm:$0xf0] }
  0x17   : > { %463 = vmatpush.bf16.msra.mxu3 %v1005_v7  ;;  %424 = vmatpush.bf16.msra.mxu0 %v993_v8  ;;  %v985_v16 = vor.u32 %v1165_v13, %v984_v11  ;;  %v989_v17 = vor.u32 %v1163_v14, %v986_v15  ;;  %v976_v18 = vld [vmem:[%s1716_s1 + $0xc0] sm:$0xf]  ;;  %v1164_v19 = vld [vmem:[%s1716_s1 + $0xcc] sm:$0xf0]  ;;  %v1162_v20 = vld [vmem:[%s1716_s1 + $0xc4] sm:$0xf] }
  0x18   : > { %437 = vmatpush.bf16.msra.mxu1 %v997_v12  ;;  %v977_v21 = vor.u32 %v1164_v19, %v976_v18  ;;  %v978_v22 = vld [vmem:[%s1716_s1 + $0xd0] sm:$0xf0]  ;;  %v968_v23 = vld [vmem:[%s1716_s1 + $0xa8] sm:$0xf]  ;;  %v1161_v24 = vld [vmem:[%s1716_s1 + $0xb4] sm:$0xf0] }
  0x19   : > { %v981_v25 = vor.u32 %v1162_v20, %v978_v22  ;;  %v1159_v26 = vld [vmem:[%s1716_s1 + $0xac] sm:$0xf]  ;;  %v970_v27 = vld [vmem:[%s1716_s1 + $0xb8] sm:$0xf0]  ;;  %v960_v28 = vld [vmem:[%s1716_s1 + $0xa0] sm:$0xf]  ;;  %v969_v29 = vor.u32 %v1161_v24, %v968_v23 }
  0x1a   : > { %451 = vmatpush.bf16.msra.mxu2 %v985_v16  ;;  %v1160_v30 = vld [vmem:[%s1716_s1 + $0xac] sm:$0xf0]  ;;  %v1158_v31 = vld [vmem:[%s1716_s1 + $0xa4] sm:$0xf]  ;;  %v962_v32 = vld [vmem:[%s1716_s1 + $0xb0] sm:$0xf0]  ;;  %v973_v33 = vor.u32 %v1159_v26, %v970_v27 }
  0x1b   : > { %464 = vmatpush.bf16.msra.mxu3 %v989_v17  ;;  %425 = vmatpush.bf16.msra.mxu0 %v977_v21  ;;  %v961_v34 = vor.u32 %v1160_v30, %v960_v28  ;;  %v952_v35 = vld [vmem:[%s1716_s1 + $0x88] sm:$0xf]  ;;  %v1157_v36 = vld [vmem:[%s1716_s1 + $0x94] sm:$0xf0]  ;;  %v1155_v37 = vld [vmem:[%s1716_s1 + $0x8c] sm:$0xf]  ;;  %v965_v38 = vor.u32 %v1158_v31, %v962_v32 }
  0x1c   : > { %438 = vmatpush.bf16.msra.mxu1 %v981_v25  ;;  %v954_v39 = vld [vmem:[%s1716_s1 + $0x98] sm:$0xf0]  ;;  %v944_v40 = vld [vmem:[%s1716_s1 + $0x80] sm:$0xf]  ;;  %v1156_v41 = vld [vmem:[%s1716_s1 + $0x8c] sm:$0xf0]  ;;  %v953_v44 = vor.u32 %v1157_v36, %v952_v35 }
  0x1d   : > { %v1154_v42 = vld [vmem:[%s1716_s1 + $0x84] sm:$0xf]  ;;  %v946_v43 = vld [vmem:[%s1716_s1 + $0x90] sm:$0xf0]  ;;  %v957_v45 = vor.u32 %v1155_v37, %v954_v39  ;;  %v945_v46 = vor.u32 %v1156_v41, %v944_v40  ;;  %v936_v47 = vld [vmem:[%s1716_s1 + $0x68] sm:$0xf] }
  0x1e   : > { %452 = vmatpush.bf16.msra.mxu2 %v969_v29  ;;  %v1153_v48 = vld [vmem:[%s1716_s1 + $0x74] sm:$0xf0]  ;;  %v1151_v49 = vld [vmem:[%s1716_s1 + $0x6c] sm:$0xf]  ;;  %v949_v50 = vor.u32 %v1154_v42, %v946_v43  ;;  %v938_v51 = vld [vmem:[%s1716_s1 + $0x78] sm:$0xf0] }
  0x1f   : > { %465 = vmatpush.bf16.msra.mxu3 %v973_v33  ;;  %426 = vmatpush.bf16.msra.mxu0 %v961_v34  ;;  %v928_v52 = vld [vmem:[%s1716_s1 + $0x60] sm:$0xf]  ;;  %v1152_v53 = vld [vmem:[%s1716_s1 + $0x6c] sm:$0xf0]  ;;  %v1150_v54 = vld [vmem:[%s1716_s1 + $0x64] sm:$0xf]  ;;  %v937_v56 = vor.u32 %v1153_v48, %v936_v47  ;;  %v941_v57 = vor.u32 %v1151_v49, %v938_v51 }
  0x20   : > { %439 = vmatpush.bf16.msra.mxu1 %v965_v38  ;;  %v930_v55 = vld [vmem:[%s1716_s1 + $0x70] sm:$0xf0]  ;;  %v929_v58 = vor.u32 %v1152_v53, %v928_v52  ;;  %v920_v59 = vld [vmem:[%s1716_s1 + $0x48] sm:$0xf]  ;;  %v1149_v60 = vld [vmem:[%s1716_s1 + $0x54] sm:$0xf0] }
  0x21   : > { %v1147_v61 = vld [vmem:[%s1716_s1 + $0x4c] sm:$0xf]  ;;  %v933_v62 = vor.u32 %v1150_v54, %v930_v55  ;;  %v922_v63 = vld [vmem:[%s1716_s1 + $0x58] sm:$0xf0]  ;;  %v912_v0 = vld [vmem:[%s1716_s1 + $0x40] sm:$0xf]  ;;  %v921_v4 = vor.u32 %v1149_v60, %v920_v59 }
  0x22   : > { %453 = vmatpush.bf16.msra.mxu2 %v953_v44  ;;  %v1148_v1 = vld [vmem:[%s1716_s1 + $0x4c] sm:$0xf0]  ;;  %v1146_v2 = vld [vmem:[%s1716_s1 + $0x44] sm:$0xf]  ;;  %v914_v3 = vld [vmem:[%s1716_s1 + $0x50] sm:$0xf0]  ;;  %v925_v6 = vor.u32 %v1147_v61, %v922_v63 }
  0x23   : > { %466 = vmatpush.bf16.msra.mxu3 %v957_v45  ;;  %427 = vmatpush.bf16.msra.mxu0 %v945_v46  ;;  %v904_v5 = vld [vmem:[%s1716_s1 + $0x28] sm:$0xf]  ;;  %v913_v7 = vor.u32 %v1148_v1, %v912_v0  ;;  %v1145_v8 = vld [vmem:[%s1716_s1 + $0x34] sm:$0xf0]  ;;  %v1143_v9 = vld [vmem:[%s1716_s1 + $0x2c] sm:$0xf]  ;;  %v917_v10 = vor.u32 %v1146_v2, %v914_v3 }
  0x24   : > { %440 = vmatpush.bf16.msra.mxu1 %v949_v50  ;;  %v906_v11 = vld [vmem:[%s1716_s1 + $0x38] sm:$0xf0]  ;;  %v896_v12 = vld [vmem:[%s1716_s1 + $0x20] sm:$0xf]  ;;  %v1144_v13 = vld [vmem:[%s1716_s1 + $0x2c] sm:$0xf0]  ;;  %v905_v16 = vor.u32 %v1145_v8, %v904_v5 }
  0x25   : > { %v1142_v14 = vld [vmem:[%s1716_s1 + $0x24] sm:$0xf]  ;;  %v898_v15 = vld [vmem:[%s1716_s1 + $0x30] sm:$0xf0]  ;;  %s217_s30 = scalar_select %p216_p10, %s1357_s22, 1  ;;  %v909_v18 = vor.u32 %v1143_v9, %v906_v11  ;;  %v897_v19 = vor.u32 %v1144_v13, %v896_v12  ;;  %v1177_v33 = vld [vmem:[%s1718_s3 + $0x38] sm:$0xff] }
  0x26   : > { %454 = vmatpush.bf16.msra.mxu2 %v937_v56  ;;  %v888_v17 = vld [vmem:[%s1716_s1 + $0x8] sm:$0xf]  ;;  %v1141_v20 = vld [vmem:[%s1716_s1 + $0x14] sm:$0xf0]  ;;  %v1139_v21 = vld [vmem:[%s1716_s1 + $0xc] sm:$0xf]  ;;  %v901_v22 = vor.u32 %v1142_v14, %v898_v15 }
  0x27   : > { %467 = vmatpush.bf16.msra.mxu3 %v941_v57  ;;  %428 = vmatpush.bf16.msra.mxu0 %v929_v58  ;;  %s877_s12 = sshll.u32 %s217_s30, 3  ;;  %v890_v23 = vld [vmem:[%s1716_s1 + $0x18] sm:$0xf0]  ;;  %v880_v24 = vld [vmem:[%s1716_s1] sm:$0xf]  ;;  %v889_v28 = vor.u32 %v1141_v20, %v888_v17  ;;  %v1176_v37 = vld [vmem:[%s1718_s3 + $0x30] sm:$0xff] }
  0x28   : > { %441 = vmatpush.bf16.msra.mxu1 %v933_v62  ;;  %v1140_v25 = vld [vmem:[%s1716_s1 + $0xc] sm:$0xf0]  ;;  %s219_s6 = scalar_lea.vmem %s1715_s0, %s877_s12  ;;  %v1138_v26 = vld [vmem:[%s1716_s1 + $0x4] sm:$0xf]  ;;  %v882_v27 = vld [vmem:[%s1716_s1 + $0x10] sm:$0xf0]  ;;  %v893_v30 = vor.u32 %v1139_v21, %v890_v23 }
  0x29   : > { %v220_v29 = vld [vmem:[%s219_s6] sm:$0xff]  ;;  %v881_v31 = vor.u32 %v1140_v25, %v880_v24  ;;  %v885_v32 = vor.u32 %v1138_v26, %v882_v27  ;;  %v1185_v35 = vld [vmem:[%s1718_s3 + $0x78] sm:$0xff]  ;;  %v1184_v39 = vld [vmem:[%s1718_s3 + $0x70] sm:$0xff]  ;;  %s810_s6 = sshll.u32 %s215_s26, 4  ;;  %s798_s30 = scalar_lea.sflag [#allocation3], %s213_s14  ;;  %s811_s6 = int_to_ptr.vmem [resolvable:$true] %s810_s6 }
  0x2a   : > { %455 = vmatpush.bf16.msra.mxu2 %v921_v4  ;;  %v221_v34 = vpack.c.bf16 %v220_v29, %v220_v29  ;;  %v1193_v36 = vld [vmem:[%s1718_s3 + $0xb8] sm:$0xff]  ;;  %v1192_v40 = vld [vmem:[%s1718_s3 + $0xb0] sm:$0xff]  ;;  %v1175_v41 = vld [vmem:[%s1718_s3 + $0x28] sm:$0xff]  ;;  %s1256_s22 = sshra.s32 %s813_s7, 4  ;;  %s1257_s22 = int_to_ptr.hbm [resolvable:$true] %s1256_s22 }
  0x2b   : > { %468 = vmatpush.bf16.msra.mxu3 %v925_v6  ;;  %429 = vmatpush.bf16.msra.mxu0 %v913_v7  ;;  %v1201_v38 = vld [vmem:[%s1718_s3 + $0xf8] sm:$0xff]  ;;  %v1200_v42 = vld [vmem:[%s1718_s3 + $0xf0] sm:$0xff]  ;;  %v1183_v43 = vld [vmem:[%s1718_s3 + $0x68] sm:$0xff]  ;;  %s1258_s8 = scalar_lea.hbm %s1257_s22, 8  ;;  %p1263_p0 = scmp.lt.s32.totalorder %s1257_s22, %s1720_s5 }
  0x2c   : > { %442 = vmatpush.bf16.msra.mxu1 %v917_v10  ;;  %v1191_v44 = vld [vmem:[%s1718_s3 + $0xa8] sm:$0xff]  ;;  %v1174_v45 = vld [vmem:[%s1718_s3 + $0x20] sm:$0xff]  ;;  %v1173_v49 = vld [vmem:[%s1718_s3 + $0x18] sm:$0xff]  ;;  %p1259_p11 = scmp.ne.s32.totalorder %s1257_s22, %s1258_s8  ;;  %p1264_p1 = scmp.lt.s32.totalorder %s1262_s11, %s1258_s8 }
  0x2d   : > { %v1199_v46 = vld [vmem:[%s1718_s3 + $0xe8] sm:$0xff]  ;;  %v1182_v47 = vld [vmem:[%s1718_s3 + $0x60] sm:$0xff]  ;;  %v1181_v51 = vld [vmem:[%s1718_s3 + $0x58] sm:$0xff] }
  0x2e   : > { %456 = vmatpush.bf16.msra.mxu2 %v905_v16  ;;  %v1190_v48 = vld [vmem:[%s1718_s3 + $0xa0] sm:$0xff]  ;;  %v1189_v52 = vld [vmem:[%s1718_s3 + $0x98] sm:$0xff]  ;;  %v1172_v53 = vld [vmem:[%s1718_s3 + $0x10] sm:$0xff]  ;;  %p1260_p12 = pnand %p1259_p11, %p1374_p5  ;;  %p1265_p2 = por %p1264_p1, %p1263_p0 }
  0x2f   : > { %469 = vmatpush.bf16.msra.mxu3 %v909_v18  ;;  %430 = vmatpush.bf16.msra.mxu0 %v897_v19  ;;  %v1198_v50 = vld [vmem:[%s1718_s3 + $0xe0] sm:$0xff]  ;;  %v1197_v54 = vld [vmem:[%s1718_s3 + $0xd8] sm:$0xff]  ;;  %v1180_v55 = vld [vmem:[%s1718_s3 + $0x50] sm:$0xff] }
  0x30   : > { %443 = vmatpush.bf16.msra.mxu1 %v901_v22  ;;  %v1171_v56 = vld [vmem:[%s1718_s3 + $0x8] sm:$0xff]  ;;  %v1188_v57 = vld [vmem:[%s1718_s3 + $0x90] sm:$0xff]  ;;  %v1170_v60 = vld [vmem:[%s1718_s3] sm:$0xff]  ;;  %p1261_p13 = pneg %p1260_p12 }
  0x31   : > { %v1196_v58 = vld [vmem:[%s1718_s3 + $0xd0] sm:$0xff]  ;;  %v1179_v59 = vld [vmem:[%s1718_s3 + $0x48] sm:$0xff]  ;;  %v1178_v63 = vld [vmem:[%s1718_s3 + $0x40] sm:$0xff] }
  0x32   : > { %457 = vmatpush.bf16.msra.mxu2 %v889_v28  ;;  %v1187_v61 = vld [vmem:[%s1718_s3 + $0x88] sm:$0xff]  ;;  %v1186_v0 = vld [vmem:[%s1718_s3 + $0x80] sm:$0xff]  ;;  %p1266_p3 = pnand %p1265_p2, %p1261_p13 }
  0x33   : > { %470 = vmatpush.bf16.msra.mxu3 %v893_v30  ;;  %431 = vmatpush.bf16.msra.mxu0 %v881_v31  ;;  %v1195_v62 = vld [vmem:[%s1718_s3 + $0xc8] sm:$0xff]  ;;  %v1194_v1 = vld [vmem:[%s1718_s3 + $0xc0] sm:$0xff] }
  0x34   : > { %444 = vmatpush.bf16.msra.mxu1 %v885_v32  ;;  %v254_v2 = vld [vmem:[%s1717_s2] sm:$0xf] }
  0x35   : > { %458 = vmatmul.bf16.vlgmr.msra.gmra.mxu2 %v221_v34  ;;  %v256_v3 = vperm.slane %v254_v2, 0  ;;  %v257_v4 = vperm.slane %v254_v2, 1  ;;  %v258_v9 = vperm.slane %v254_v2, 2  ;;  %v259_v11 = vperm.slane %v254_v2, 3  ;;  %v1241_v27 = vld [vmem:[%s1719_s4] ss:$0 sm:$0xff] }
  0x36   : > { %471 = vmatmul.bf16.vlgmr.msra.gmra.mxu3 %v221_v34  ;;  %432 = vmatmul.bf16.vlgmr.msra.gmra.mxu0 %v221_v34 }
  0x37   : > { %744 = vmatpush.bf16.msrb.mxu0 %v1177_v33  ;;  %445 = vmatmul.bf16.vlgmr.msra.gmra.mxu1 %v221_v34 }
  0x38   : > { %757 = vmatpush.bf16.msrb.mxu1 %v1185_v35  ;;  %770 = vmatpush.bf16.msrb.mxu2 %v1193_v36 }
  0x39   : > { %783 = vmatpush.bf16.msrb.mxu3 %v1201_v38 }
  0x3b   : > { %745 = vmatpush.bf16.msrb.mxu0 %v1176_v37 }
  0x3c   : > { %758 = vmatpush.bf16.msrb.mxu1 %v1184_v39  ;;  %771 = vmatpush.bf16.msrb.mxu2 %v1192_v40 }
  0x3d   : > { %784 = vmatpush.bf16.msrb.mxu3 %v1200_v42 }
  0x3f   : > { %746 = vmatpush.bf16.msrb.mxu0 %v1175_v41 }
  0x40   : > { %759 = vmatpush.bf16.msrb.mxu1 %v1183_v43  ;;  %772 = vmatpush.bf16.msrb.mxu2 %v1191_v44 }
  0x41   : > { %785 = vmatpush.bf16.msrb.mxu3 %v1199_v46 }
  0x43   : > { %747 = vmatpush.bf16.msrb.mxu0 %v1174_v45 }
  0x44   : > { %760 = vmatpush.bf16.msrb.mxu1 %v1182_v47  ;;  %773 = vmatpush.bf16.msrb.mxu2 %v1190_v48 }
  0x45   : > { %786 = vmatpush.bf16.msrb.mxu3 %v1198_v50 }
  0x47   : > { %748 = vmatpush.bf16.msrb.mxu0 %v1173_v49 }
  0x48   : > { %761 = vmatpush.bf16.msrb.mxu1 %v1181_v51  ;;  %774 = vmatpush.bf16.msrb.mxu2 %v1189_v52 }
  0x49   : > { %787 = vmatpush.bf16.msrb.mxu3 %v1197_v54 }
  0x4b   : > { %749 = vmatpush.bf16.msrb.mxu0 %v1172_v53 }
  0x4c   : > { %762 = vmatpush.bf16.msrb.mxu1 %v1180_v55  ;;  %775 = vmatpush.bf16.msrb.mxu2 %v1188_v57 }
  0x4d   : > { %788 = vmatpush.bf16.msrb.mxu3 %v1196_v58 }
  0x4f   : > { %750 = vmatpush.bf16.msrb.mxu0 %v1171_v56 }
  0x50   : > { %763 = vmatpush.bf16.msrb.mxu1 %v1179_v59  ;;  %776 = vmatpush.bf16.msrb.mxu2 %v1187_v61 }
  0x51   : > { %789 = vmatpush.bf16.msrb.mxu3 %v1195_v62 }
  0x53   : > { %751 = vmatpush.bf16.msrb.mxu0 %v1170_v60 }
  0x54   : > { %764 = vmatpush.bf16.msrb.mxu1 %v1178_v63  ;;  %777 = vmatpush.bf16.msrb.mxu2 %v1186_v0 }
  0x55   : > { %790 = vmatpush.bf16.msrb.mxu3 %v1194_v1 }
  0xb3   : > { %v433_v5 = vpop.f32.mrf.mxu0 }
  0xb4   : > { %v434_v6 = vadd.f32 %v433_v5, %v256_v3  ;;  %v446_v7 = vpop.f32.mrf.mxu1 }
  0xb5   : > { %v447_v8 = vadd.f32 %v446_v7, %v257_v4 }
  0xb6   : > { %v476_v10 = vmax.f32 %v434_v6, 0.0 }
  0xb7   : > { %v477_v12 = vmax.f32 %v447_v8, 0.0 }
  0xb8   : > { %v480_v13 = vpack.c.bf16 %v476_v10, %v476_v10  ;;  %v459_v14 = vpop.f32.mrf.mxu2 }
  0xb9   : > { %v481_v15 = vpack.c.bf16 %v477_v12, %v477_v12  ;;  %v460_v16 = vadd.f32 %v459_v14, %v258_v9  ;;  %v472_v17 = vpop.f32.mrf.mxu3 }
  0xba   : > { %v473_v18 = vadd.f32 %v472_v17, %v259_v11  ;;  %752 = vmatmul.bf16.vlgmr.msrb.gmra.mxu0 %v480_v13 }
  0xbb   : > { %v478_v19 = vmax.f32 %v460_v16, 0.0  ;;  %v435_v20 = vpop.f32.mrf.mxu0  ;;  %765 = vmatmul.bf16.vlgmr.msrb.gmra.mxu1 %v481_v15 }
  0xbc   : > { %v479_v21 = vmax.f32 %v473_v18, 0.0  ;;  %v448_v22 = vpop.f32.mrf.mxu1 }
  0xbd   : > { %v482_v23 = vpack.c.bf16 %v478_v19, %v478_v19 }
  0xbe   : > { %v483_v24 = vpack.c.bf16 %v479_v21, %v479_v21 }
  0xbf   : > { %778 = vmatmul.bf16.vlgmr.msrb.gmra.mxu2 %v482_v23 }
  0xc0   : > { %791 = vmatmul.bf16.vlgmr.msrb.gmra.mxu3 %v483_v24  ;;  %v461_v25 = vpop.f32.mrf.mxu2 }
  0xc1   : > { %v474_v26 = vpop.f32.mrf.mxu3 }
 0x137   : > { %v753_v28 = vpop.f32.mrf.mxu0 }
 0x138   : > { %v766_v29 = vpop.f32.mrf.mxu1  ;;  %v754_v30 = vadd.f32 %v1241_v27, %v753_v28 }
 0x13a   : > { %v767_v31 = vadd.f32 %v766_v29, %v754_v30 }
 0x13f   : > { %v755_v32 = vpop.f32.mrf.mxu0 }
 0x140   : > { %v768_v33 = vpop.f32.mrf.mxu1 }
 0x142   : > { %v779_v34 = vpop.f32.mrf.mxu2 }
 0x143   : > { %v780_v35 = vadd.f32 %v779_v34, %v767_v31  ;;  %v792_v36 = vpop.f32.mrf.mxu3 }
 0x145   : > { %v793_v37 = vadd.f32 %v792_v36, %v780_v35 }
 0x147   : > { %796 = vst [vmem:[%s215_s26] sm:$0xff] %v793_v37 }
 0x148   : > { %1269 = shalt.err (!%p1266_p3)
}
 0x149   : > { %1202 = dma.vmem_to_hbm [thread:$0]  (%p1374_p5), %s811_s6, 128, %s813_s7, %s798_s30  }
 0x14a   : > { %v781_v38 = vpop.f32.mrf.mxu2 }
 0x14b   : > { %v794_v39 = vpop.f32.mrf.mxu3 }
 0x14c PF: > { %p1208_p4 = scmp.ge.s32.totalorder %s1304_s21, 2  ;;  %s824_s14 = sand.u32 1, %s1292_s18  }
 0x14d   : > { %s825_s15 = scalar_lea.sflag [#allocation3], %s824_s14 }
 0x14e   : > { %p1205_p7 = pnand %p1208_p4, %p1378_p6 }
 0x150   : > { %p1206_p8 = pneg %p1205_p7 }
 0x152   : > { %1287 = dma.done.wait (%p1206_p8), %s825_s15, 128  }
 0x153   : > { %1289 = vsyncadd (%p1206_p8), %s825_s15, 4294967168  ;;  %p15_p5 = scmp.ge.s32.totalorder %s1361_s24, 4   ;;  %s1723_s18 = smov %s1296_s19 }
 0x154   : > { %s1724_s19 = smov %s1300_s20  ;;  %s1725_s20 = smov %s1372_s27 }
 0x155   : > { %s1726_s21 = smov %s1361_s24  ;;  %17 = sbr.rel (!%p15_p5) target bundleno = 3 (0x3), region = 75 }
 0x15a   :  { %831 = vsyncpa [#allocation3], 1 }
 0x15b   :  { %833 = vsyncpa [#allocation3 + $0x1], 1 }

</bundles_post_ra>
